<compile_context>
chip_gen: v7x
topology: tpu7x:2x2x1
jax: 0.10.0
libtpu: 0.0.40
codegen_flags: <defaults>
</compile_context>

<pallas_src>
import functools

import jax
import jax.numpy as jnp
from jax.experimental import pallas as pl
from jax.experimental.pallas import tpu as pltpu


_PAD_LOGIT = -1.0e4  # BCE(x=-1e4, t=0) == 0 exactly in f32 (exp underflows).


def _round_up(x, m):
    return ((x + m - 1) // m) * m


def _bce_sum_kernel(idx_ref, x_ref, t_ref, out_ref):
    """Accumulate lane-wise partial sums of elementwise BCE-with-logits.

    idx_ref is the scalar-prefetched pair->target map (consumed only by the
    BlockSpec index_maps; unused inside the body).
    """
    del idx_ref
    j = pl.program_id(1)

    @pl.when(j == 0)
    def _():
        out_ref[...] = jnp.zeros_like(out_ref)

    x = x_ref[...].astype(jnp.float32)      # (1, block_r, 128)
    t = t_ref[...].astype(jnp.float32)
    # Numerically stable BCE with logits: max(x,0) - x*t + log1p(exp(-|x|)).
    # exp/log1p go to the EUP slot; the rest is VPU elementwise.
    elem = jnp.maximum(x, 0.0) - x * t + jnp.log1p(jnp.exp(-jnp.abs(x)))
    # Reduce over sublanes only; keep the 128 lanes -> lane-dense accumulator.
    out_ref[...] += jnp.sum(elem, axis=1, keepdims=True)   # (1, 1, 128)


@functools.partial(jax.jit, static_argnames=("block_r",))
def _bce_pair_sums(preds, targets, pair_to_tgt, *, block_r=512):
    """preds: (P, N) logits; targets: (T, N) {0,1}; pair_to_tgt: (P,) int32.

    Returns (P,) float32: sum of elementwise BCE-with-logits per pair, where
    pair p is scored against targets[pair_to_tgt[p]].
    """
    P, N = preds.shape
    T = targets.shape[0]
    rows = pl.cdiv(N, 128)
    block_r = min(block_r, _round_up(rows, 8))
    rows_pad = _round_up(rows, block_r)
    pad = rows_pad * 128 - N

    preds_p = jnp.pad(preds, ((0, 0), (0, pad)), constant_values=_PAD_LOGIT)
    targs_p = jnp.pad(targets, ((0, 0), (0, pad)))            # pad targets with 0
    preds3 = preds_p.reshape(P, rows_pad, 128)
    targs3 = targs_p.reshape(T, rows_pad, 128)
    n_tiles = rows_pad // block_r

    out = pl.pallas_call(
        _bce_sum_kernel,
        out_shape=jax.ShapeDtypeStruct((P, 1, 128), jnp.float32),
        grid_spec=pltpu.PrefetchScalarGridSpec(
            num_scalar_prefetch=1,
            grid=(P, n_tiles),
            in_specs=[
                pl.BlockSpec((1, block_r, 128), lambda p, j, idx: (p, j, 0)),
                pl.BlockSpec((1, block_r, 128),
                             lambda p, j, idx: (idx[p], j, 0)),
            ],
            out_specs=pl.BlockSpec((1, 1, 128), lambda p, j, idx: (p, 0, 0)),
        ),
        compiler_params=pltpu.CompilerParams(
            dimension_semantics=("parallel", "arbitrary"),
        ),
    )(pair_to_tgt, preds3, targs3)
    return jnp.sum(out.reshape(P, 128), axis=-1)


def bce_forward(scaled_preds, gt):
    """Pallas implementation of BCE.forward(scaled_preds, gt).

    scaled_preds: list (len num) of lists of (B, C, H, W) logit arrays; the
                  first entry of each inner list is skipped (as in PyTorch).
    gt:           (B, num, C, H, W) binary targets.
    Returns a scalar: sum over all used pairs of mean BCE-with-logits.
    """
    B, num, C, H, W = gt.shape
    n_elem = B * C * H * W

    # Restructure the nested-list loop into one (P, N) prediction batch plus a
    # deduplicated (num, N) target batch and a pair->target index map.
    preds, pair_idx = [], []
    for inum in range(num):
        for x in scaled_preds[inum][1:]:
            preds.append(x.reshape(-1))
            pair_idx.append(inum)
    preds = jnp.stack(preds)                                     # (P, N)
    targets = gt.transpose(1, 0, 2, 3, 4).reshape(num, -1)       # (num, N)
    pair_to_tgt = jnp.asarray(pair_idx, dtype=jnp.int32)         # (P,)

    sums = _bce_pair_sums(preds, targets, pair_to_tgt)
    # Per-pair mean + sum over pairs (cheap) done in plain JAX.
    return jnp.sum(sums / jnp.float32(n_elem))


def bce_forward_ref(scaled_preds, gt):
    """Pure-JAX reference mirroring the PyTorch double loop."""
    _, num, _, _, _ = gt.shape
    loss = jnp.float32(0.0)
    for inum in range(num):
        t = gt[:, inum]
        for x in scaled_preds[inum][1:]:
            elem = (jnp.maximum(x, 0.0) - x * t
                    + jnp.log1p(jnp.exp(-jnp.abs(x))))
            loss = loss + jnp.mean(elem)
    return loss


if __name__ == "__main__":
    key = jax.random.PRNGKey(0)
    B, num, C, H, W = 2, 2, 4, 16, 16
    n_scales = 3  # first scale of each inner list is skipped, as in the module

    keys = jax.random.split(key, 1 + num * n_scales)
    gt = (jax.random.uniform(keys[0], (B, num, C, H, W)) > 0.5).astype(jnp.float32)
    scaled_preds = [
        [jax.random.normal(keys[1 + i * n_scales + s], (B, C, H, W), jnp.float32)
         for s in range(n_scales)]
        for i in range(num)
    ]

    out = bce_forward(scaled_preds, gt)
    out = jax.block_until_ready(out)

    ref = bce_forward_ref(scaled_preds, gt)
    assert jnp.allclose(out, ref, rtol=1e-5, atol=1e-5), (out, ref)
    print("KERNEL_OK")
</pallas_src>

<mosaic_0001>
module attributes {stable_mosaic.version = 11 : i64} {
  func.func @_bce_sum_kernel(%arg0: i32, %arg1: i32, %arg2: memref<4xi32, #tpu.memory_space<smem>>, %arg3: memref<1x16x128xf32, #tpu.memory_space<vmem>>, %arg4: memref<1x16x128xf32, #tpu.memory_space<vmem>>, %arg5: memref<1x1x128xf32, #tpu.memory_space<vmem>>) attributes {dimension_semantics = [#tpu.dimension_semantics<parallel>, #tpu.dimension_semantics<arbitrary>], iteration_bounds = array<i64: 4, 1>, scalar_prefetch = 1 : i64, scratch_operands = 0 : i64, tpu.core_type = #tpu.core_type<tc>, window_params = [{transform_indices = @transform_0, window_bounds = array<i64: 1, 16, 128>}, {transform_indices = @transform_1, window_bounds = array<i64: 1, 16, 128>}, {transform_indices = @transform_2, window_bounds = array<i64: 1, 1, 128>}]} {
    %c0_i32 = arith.constant 0 : i32
    %0 = arith.cmpi eq, %arg1, %c0_i32 : i32
    %1 = arith.extui %0 : i1 to i32
    %c0_i32_0 = arith.constant 0 : i32
    %2 = arith.cmpi ne, %1, %c0_i32_0 : i32
    scf.if %2 {
      %cst_14 = arith.constant 0.000000e+00 : f32
      %20 = vector.broadcast %cst_14 : f32 to vector<1x1x128xf32>
      %c0_15 = arith.constant 0 : index
      %c0_16 = arith.constant 0 : index
      %c0_17 = arith.constant 0 : index
      %21 = vector.load %arg5[%c0_15, %c0_16, %c0_17] : memref<1x1x128xf32, #tpu.memory_space<vmem>>, vector<1x1x128xf32>
      tpu.vector_store %arg5[%c0_15, %c0_16, %c0_17], %20 {strides = array<i32>} : memref<1x1x128xf32, #tpu.memory_space<vmem>>, vector<1x1x128xf32>,
    } else {
    }
    %c0 = arith.constant 0 : index
    %c0_1 = arith.constant 0 : index
    %c0_2 = arith.constant 0 : index
    %3 = vector.load %arg3[%c0, %c0_1, %c0_2] : memref<1x16x128xf32, #tpu.memory_space<vmem>>, vector<1x16x128xf32>
    %c0_3 = arith.constant 0 : index
    %c0_4 = arith.constant 0 : index
    %c0_5 = arith.constant 0 : index
    %4 = vector.load %arg4[%c0_3, %c0_4, %c0_5] : memref<1x16x128xf32, #tpu.memory_space<vmem>>, vector<1x16x128xf32>
    %cst = arith.constant 0.000000e+00 : f32
    %5 = vector.broadcast %cst : f32 to vector<1x16x128xf32>
    %6 = arith.maximumf %3, %5 : vector<1x16x128xf32>
    %7 = arith.mulf %3, %4 : vector<1x16x128xf32>
    %8 = arith.subf %6, %7 : vector<1x16x128xf32>
    %9 = math.absf %3 : vector<1x16x128xf32>
    %cst_6 = arith.constant 0.000000e+00 : f32
    %10 = vector.broadcast %cst_6 : f32 to vector<1x16x128xf32>
    %11 = arith.subf %10, %9 : vector<1x16x128xf32>
    %12 = math.exp %11 : vector<1x16x128xf32>
    %13 = math.log1p %12 : vector<1x16x128xf32>
    %14 = arith.addf %8, %13 : vector<1x16x128xf32>
    %c0_7 = arith.constant 0 : index
    %c0_8 = arith.constant 0 : index
    %c0_9 = arith.constant 0 : index
    %15 = vector.load %arg5[%c0_7, %c0_8, %c0_9] : memref<1x1x128xf32, #tpu.memory_space<vmem>>, vector<1x1x128xf32>
    %cst_10 = arith.constant dense<0.000000e+00> : vector<1x128xf32>
    %16 = vector.multi_reduction <add>, %14, %cst_10 [1] : vector<1x16x128xf32> to vector<1x128xf32>
    %17 = vector.shape_cast %16 : vector<1x128xf32> to vector<1x1x128xf32>
    %18 = arith.addf %15, %17 : vector<1x1x128xf32>
    %c0_11 = arith.constant 0 : index
    %c0_12 = arith.constant 0 : index
    %c0_13 = arith.constant 0 : index
    %19 = vector.load %arg5[%c0_11, %c0_12, %c0_13] : memref<1x1x128xf32, #tpu.memory_space<vmem>>, vector<1x1x128xf32>
    tpu.vector_store %arg5[%c0_11, %c0_12, %c0_13], %18 {strides = array<i32>} : memref<1x1x128xf32, #tpu.memory_space<vmem>>, vector<1x1x128xf32>,
    return
  }
  func.func @transform_0(%arg0: i32, %arg1: i32, %arg2: memref<4xi32, #tpu.memory_space<smem>>) -> (i32, i32, i32) {
    %c0_i32 = arith.constant 0 : i32
    %c0_i32_0 = arith.constant 0 : i32
    return %arg0, %arg1, %c0_i32 : i32, i32, i32
  }
  func.func @transform_1(%arg0: i32, %arg1: i32, %arg2: memref<4xi32, #tpu.memory_space<smem>>) -> (i32, i32, i32) {
    %0 = arith.index_cast %arg0 : i32 to index
    %1 = memref.load %arg2[%0] : memref<4xi32, #tpu.memory_space<smem>>
    %c0_i32 = arith.constant 0 : i32
    %c0_i32_0 = arith.constant 0 : i32
    return %1, %arg1, %c0_i32 : i32, i32, i32
  }
  func.func @transform_2(%arg0: i32, %arg1: i32, %arg2: memref<4xi32, #tpu.memory_space<smem>>) -> (i32, i32, i32) {
    %c0_i32 = arith.constant 0 : i32
    %c0_i32_0 = arith.constant 0 : i32
    %c0_i32_1 = arith.constant 0 : i32
    return %arg0, %c0_i32, %c0_i32_0 : i32, i32, i32
  }
}

</mosaic_0001>

<bundles_post_ra>
// kernel: _bce_pair_sums.1
= control target key start
LH: loop header
LB: loop body
LE: loop exit
PB: predicated region body
PF: predicated region fallthrough
CT: control target
= control target key end

     0   :  { %s501_s0 = inlined_call_operand.vmem [shape: s32[4], index: 0, kind: input, shape index: {}]   ;;  %s502_s1 = inlined_call_operand.vmem [shape: f32[4,16,128], index: 1, kind: input, shape index: {}]   ;;  %s503_s2 = inlined_call_operand.vmem [shape: f32[2,16,128], index: 2, kind: input, shape index: {}]   ;;  %s504_s3 = inlined_call_operand.vmem [shape: f32[4,1,128], index: 3, kind: output, shape index: {}]  }
   0x1   :  { %s8_s14 = sshll.u32 %s501_s0, 4  ;;  %s9_s14 = int_to_ptr.vmem [resolvable:$true] %s8_s14 }
   0x2   :  { %s397_s15 = scalar_lea.vmem %s9_s14, 16  ;;  %p402_p1 = scmp.lt.s32.totalorder %s9_s14, %s9_s14 }
   0x3   :  { %p398_p0 = scmp.ne.s32.totalorder %s9_s14, %s397_s15  ;;  %p403_p2 = scmp.lt.s32.totalorder %s397_s15, %s397_s15 }
   0x5   :  { %p404_p3 = por %p403_p2, %p402_p1 }
   0x7   :  { %p405_p4 = pnand %p404_p3, %p398_p0 }
   0x9   :  { %408 = shalt.err (!%p405_p4)  }
   0xa   :  { %s435_s16 = smov [#allocation3]  }
   0xb   :  { %11 = dma.vmem_to_smem %s9_s14, 16, %s435_s16, [#allocation2] }
   0xc   :  { %421 = dma.done.wait [#allocation2], 16 }
   0xd   :  { %422 = vsyncadd [#allocation2], 4294967280 }
   0xe   :  { %13 = sfence }
   0xf   :  { %s460_s17 = smov 0   ;;  %s462_s18 = smov 0  }
  0x10   :  { %s464_s19 = smov 0  }
  0x11 LB: > { %s31_s0 = sadd.s32 1, %s429_s18  ;;  %p354_p5 = scmp.ge.s32.totalorder %s433_s19, 1  ;;  %s433_s19 = sphi %s464_s19, %s19_s19   ;;  %s429_s18 = sphi %s462_s18, %s506_s18   ;;  %s425_s17 = sphi %s460_s17, %s505_s17  }
  0x12   : > { %p33_p6 = scmp.ge.s32.totalorder %s31_s0, 4  ;;  %p159_p7 = scmp.lt.s32.totalorder %s433_s19, 5 }
  0x14   : > { %s508_s0 = smov (%p33_p6, %s31_s0), 0  ;;  %p160_p8 = pnand %p354_p5, %p159_p7 }
  0x15   : > { %p194_p9 = scmp.lt.s32.totalorder (!%p160_p8), %s425_s17, 3  ;;  %v436_v0 = vmov (!%p160_p8), 0.0   ;;  %s203_s28 = sld [smem:[#allocation3 + %s425_s17]] (!%p160_p8) }
  0x16   : > { %163 = sbr.rel (%p160_p8) target bundleno = 87 (0x57), region = 28 }
  0x1b   : > { %p205_p10 = scmp.lt.s32.totalorder (!%p160_p8), %s203_s28, 1 }
  0x1d   : > { %s195_s20 = scalar_select %p194_p9, %s425_s17, 3 }
  0x1e   : > { %s510_s28 = smov (!%p205_p10, %s203_s28), 1 }
  0x1f   : > { %s361_s21 = sshll.u32 %s195_s20, 4  ;;  %s481_s24 = scalar_lea.vmem %s504_s3, %s195_s20 }
  0x20   : > { %s201_s27 = scalar_lea.vmem %s502_s1, %s361_s21  ;;  %222 = vst [vmem:[%s481_s24] sm:$0x1] %v436_v0  ;;  %s362_s29 = sshll.u32 %s510_s28, 4 }
  0x21   : > { %v223_v1 = vld [vmem:[%s201_s27] sm:$0xff]  ;;  %v224_v2 = vld [vmem:[%s201_s27 + $0x8] sm:$0xff]  ;;  %s212_s5 = scalar_lea.vmem %s503_s2, %s362_s29 }
  0x22   : > { %v233_v3 = vand.u32 2147483647, %v223_v1  ;;  %v234_v4 = vand.u32 2147483647, %v224_v2  ;;  %v225_v15 = vld [vmem:[%s212_s5] sm:$0xff]  ;;  %v226_v16 = vld [vmem:[%s212_s5 + $0x8] sm:$0xff] }
  0x23   : > { %v227_v18 = vmax.f32 %v223_v1, 0.0  ;;  %v229_v19 = vmul.f32 %v225_v15, %v223_v1  ;;  %v228_v22 = vmax.f32 %v224_v2, 0.0  ;;  %v230_v23 = vmul.f32 %v226_v16, %v224_v2 }
  0x24   : > { %v235_v5 = vsub.f32 0.0, %v233_v3  ;;  %v236_v6 = vsub.f32 0.0, %v234_v4 }
  0x25   : > { %v231_v27 = vsub.f32 %v227_v18, %v229_v19  ;;  %v232_v30 = vsub.f32 %v228_v22, %v230_v23 }
  0x26   : > { %v237_v7 = vmul.f32 1.442695, %v235_v5  ;;  %v239_v8 = vmul.f32 1.442695, %v236_v6 }
  0x27   : > { %v261_v43 = vld [vmem:[%s481_s24] sm:$0x1] }
  0x28   : > { %389 = vpow2.f32 %v237_v7 }
  0x29   : > { %391 = vpow2.f32 %v239_v8 }
  0x32   : > { %v390_v9 = vpop.eup %389 }
  0x33   : > { %v392_v10 = vpop.eup %391  ;;  %v241_v11 = vadd.f32 1.0, %v390_v9  ;;  %v244_v13 = vmul.f32 -0.5, %v390_v9  ;;  %v247_v20 = vand.u32 2147483647, %v390_v9 }
  0x34   : > { %v250_v12 = vadd.f32 1.0, %v392_v10  ;;  %v253_v14 = vmul.f32 -0.5, %v392_v10  ;;  %v256_v24 = vand.u32 2147483647, %v392_v10 }
  0x35   : > { %393 = vlog2.f32 %v241_v11  ;;  %v245_v17 = vadd.f32 1.0, %v244_v13  ;;  %vm248_vm0 = vcmp.lt.f32.partialorder %v247_v20, 0.0004427343 }
  0x36   : > { %395 = vlog2.f32 %v250_v12  ;;  %v254_v21 = vadd.f32 1.0, %v253_v14  ;;  %vm257_vm1 = vcmp.lt.f32.partialorder %v256_v24, 0.0004427343 }
  0x37   : > { %v246_v25 = vmul.f32 %v390_v9, %v245_v17 }
  0x38   : > { %v255_v28 = vmul.f32 %v392_v10, %v254_v21 }
  0x3f   : > { %v394_v26 = vpop.eup %393 }
  0x40   : > { %v396_v29 = vpop.eup %395  ;;  %v243_v31 = vmul.f32 0.6931472, %v394_v26 }
  0x41   : > { %v252_v32 = vmul.f32 0.6931472, %v396_v29 }
  0x42   : > { %v249_v33 = vsel %vm248_vm0, %v246_v25, %v243_v31 }
  0x43   : > { %v258_v34 = vsel %vm257_vm1, %v255_v28, %v252_v32  ;;  %v259_v35 = vadd.f32 %v249_v33, %v231_v27 }
  0x44   : > { %v260_v36 = vadd.f32 %v258_v34, %v232_v30 }
  0x46   : > { %v262_v37 = vadd.f32 %v260_v36, %v259_v35 }
  0x48   : > { %v263_v38 = vrot.slane %v262_v37, 4 }
  0x4a   : > { %v264_v39 = vadd.f32 %v263_v38, %v262_v37 }
  0x4c   : > { %v265_v40 = vrot.slane %v264_v39, 2 }
  0x4e   : > { %v266_v41 = vadd.f32 %v265_v40, %v264_v39 }
  0x50   : > { %v267_v42 = vrot.slane %v266_v41, 1 }
  0x52   : > { %v268_v44 = vadd.f32 %v267_v42, %v266_v41 }
  0x54   : > { %v269_v45 = vadd.f32 %v268_v44, %v261_v43 }
  0x56   : > { %270 = vst [vmem:[%s481_s24] sm:$0x1] %v269_v45 }
  0x57 PF: > { %s19_s19 = sadd.s32 1, %s433_s19   ;;  %s505_s17 = smov %s429_s18 }
  0x58   : > { %p16_p11 = scmp.ge.s32.totalorder %s19_s19, 6   ;;  %s506_s18 = smov %s508_s0 }
  0x5a   :  { %18 = sbr.rel (!%p16_p11) target bundleno = 17 (0x11), region = 65 }

</bundles_post_ra>
